<compile_context>
chip_gen: v7x
topology: tpu7x:2x2x1
jax: 0.10.0
libtpu: 0.0.40
codegen_flags: <defaults>
</compile_context>

<pallas_src>
import jax
import jax.numpy as jnp
from jax.experimental import pallas as pl
from jax.experimental.pallas import tpu as pltpu


def _rem_kernel(d_ref, out_ref):
    """One (tq, tk) tile of one head.

    Builds |i-j| Toeplitz offsets for this tile, truncates >200 to 0, and
    applies the distillation transform L/d * (L % d == 0).  Regular heads are
    encoded as d=1, for which the transform is the identity — no per-element
    select needed.  Integer mod/div is replaced by exact float math
    (q = round(t/d); indicator = (q*d == t)), which is a handful of VALU ops
    instead of a long integer-divide sequence.
    """
    h = pl.program_id(0)
    tq, tk = out_ref.shape
    q0 = pl.program_id(1) * tq
    k0 = pl.program_id(2) * tk

    i = jax.lax.broadcasted_iota(jnp.int32, (tq, tk), 0) + q0
    j = jax.lax.broadcasted_iota(jnp.int32, (tq, tk), 1) + k0
    t = jnp.abs(i - j)
    t = jnp.where(t > 200, 0, t)          # T[T > 200] = 0 (literal 200 in reference)
    t_f = t.astype(jnp.float32)

    d_f = d_ref[h].astype(jnp.float32)    # per-head distillation period (1 => regular)
    inv_d = 1.0 / d_f                     # scalar, once per tile
    q = jnp.round(t_f * inv_d)            # exact quotient for multiples (all ints <= 200)
    out = jnp.where(q * d_f == t_f, q, 0.0)   # L/d where L % d == 0, else 0

    out_ref[...] = out.astype(out_ref.dtype)


def _pick_tile(dim, pref, align):
    """Largest tile <= pref that divides `dim` and is a multiple of `align`.
    Falls back to the full dim (allowed by Pallas) when dim is not aligned."""
    if dim % align != 0:
        return dim
    t = min(pref, dim)
    while dim % t != 0:
        t -= align
    return t


def rem_forward(eta, nu, theta, query_len, key_len, *,
                d=(2, 3), n_head=4, truncation=200,
                out_dtype=jnp.float32, permute_output=True):
    # eta/nu/theta (and k1..k6 / the sinusoids) feed only dead code in the
    # reference forward; they do not influence the returned tensor.
    del eta, nu, theta, truncation

    n_distil = len(d)
    n_reg = n_head - n_distil
    # Regular heads encoded as d=1: L/1 with full indicator == plain Toeplitz,
    # so the kernel needs no per-element "is this a distilled head" select.
    # TODO(synk): reference leaves the first n_reg heads uninitialized
    # (torch.empty_like); we emit the plain (intended) Toeplitz for them.
    d_per_head = jnp.array([1] * n_reg + list(d), dtype=jnp.int32)

    # Lane-dense tiling: tk multiple of 128, tq multiple of 8 (or the full dim
    # for small/unaligned shapes).  512 x 1024 f32 = 2 MiB per tile; with
    # double buffering this fits comfortably in every generation's scoped VMEM.
    tq = _pick_tile(query_len, 512, 8)
    tk = _pick_tile(key_len, 1024, 128)
    grid = (n_head, query_len // tq, key_len // tk)

    grid_spec = pltpu.PrefetchScalarGridSpec(
        num_scalar_prefetch=1,
        grid=grid,
        in_specs=[],
        # Leading head dim squeezed (None) so the kernel sees a 2-D (tq, tk) ref.
        out_specs=pl.BlockSpec((None, tq, tk),
                               lambda h, qi, ki, d_ref: (h, qi, ki)),
    )

    L = pl.pallas_call(
        _rem_kernel,
        out_shape=jax.ShapeDtypeStruct((n_head, query_len, key_len), out_dtype),
        grid_spec=grid_spec,
        # Fully independent tiles: all-parallel grid lets v7x shard the work
        # across both TensorCores (harmless on v5e/v6e).
        compiler_params=pltpu.CompilerParams(
            dimension_semantics=("parallel", "parallel", "parallel")),
    )(d_per_head)

    if not permute_output:
        # Preferred layout for downstream consumers: (n_head, Q, K) is lane-dense
        # and avoids an extra full read+write of the tensor by XLA's transpose.
        return L
    # PyTorch parity: REM.permute(1, 2, 0) -> (Q, K, n_head).
    return jnp.transpose(L, (1, 2, 0))


if __name__ == "__main__":
    n_head = 4
    query_len, key_len = 8, 16

    key = jax.random.PRNGKey(0)
    k_eta, k_nu, k_theta = jax.random.split(key, 3)
    eta = jax.random.normal(k_eta, (n_head, 1, 1), dtype=jnp.float32)
    nu = jax.random.normal(k_nu, (n_head, 1, 1), dtype=jnp.float32)
    theta = jax.random.normal(k_theta, (n_head, 1, 1), dtype=jnp.float32)

    out = rem_forward(eta, nu, theta, query_len, key_len,
                      d=(2, 3), n_head=n_head)
    jax.block_until_ready(out)

    assert out.shape == (query_len, key_len, n_head), out.shape
    assert out.dtype == jnp.float32

    # Also exercise the lane-dense (H, Q, K) path.
    out_hqk = rem_forward(eta, nu, theta, query_len, key_len,
                          d=(2, 3), n_head=n_head, permute_output=False)
    jax.block_until_ready(out_hqk)
    assert out_hqk.shape == (n_head, query_len, key_len), out_hqk.shape

    # Sanity check against the reference semantics.
    import numpy as np
    i = np.arange(query_len)[:, None]
    j = np.arange(key_len)[None, :]
    t = np.abs(i - j).astype(np.float32)
    t[t > 200] = 0
    np.testing.assert_allclose(np.asarray(out[:, :, 0]), t)          # regular head
    np.testing.assert_allclose(np.asarray(out[:, :, 1]), t)          # regular head
    np.testing.assert_allclose(np.asarray(out[:, :, 2]),
                               (t / 2.0) * ((t % 2) == 0))           # distilled d=2
    np.testing.assert_allclose(np.asarray(out[:, :, 3]),
                               (t / 3.0) * ((t % 3) == 0))           # distilled d=3
    np.testing.assert_allclose(np.asarray(out_hqk),
                               np.transpose(np.asarray(out), (2, 0, 1)))

    print("KERNEL_OK")
</pallas_src>

<mosaic_0001>
module attributes {stable_mosaic.version = 11 : i64} {
  func.func @_rem_kernel(%arg0: i32, %arg1: i32, %arg2: i32, %arg3: memref<4xi32, #tpu.memory_space<smem>>, %arg4: memref<1x8x16xf32, #tpu.memory_space<vmem>>) attributes {dimension_semantics = [#tpu.dimension_semantics<parallel>, #tpu.dimension_semantics<parallel>, #tpu.dimension_semantics<parallel>], iteration_bounds = array<i64: 4, 1, 1>, scalar_prefetch = 1 : i64, scratch_operands = 0 : i64, tpu.core_type = #tpu.core_type<tc>, window_params = [{transform_indices = @transform_0, window_bounds = array<i64: 1, 8, 16>}]} {
    %c8_i32 = arith.constant 8 : i32
    %0 = arith.muli %arg1, %c8_i32 : i32
    %c16_i32 = arith.constant 16 : i32
    %1 = arith.muli %arg2, %c16_i32 : i32
    %2 = tpu.iota {dimensions = array<i32: 0>} : vector<8x16xi32>
    %3 = vector.broadcast %0 : i32 to vector<8x16xi32>
    %4 = arith.addi %2, %3 : vector<8x16xi32>
    %5 = tpu.iota {dimensions = array<i32: 1>} : vector<8x16xi32>
    %6 = vector.broadcast %1 : i32 to vector<8x16xi32>
    %7 = arith.addi %5, %6 : vector<8x16xi32>
    %8 = arith.subi %4, %7 : vector<8x16xi32>
    %9 = math.absi %8 : vector<8x16xi32>
    %c200_i32 = arith.constant 200 : i32
    %10 = vector.broadcast %c200_i32 : i32 to vector<8x16xi32>
    %11 = arith.cmpi sgt, %9, %10 : vector<8x16xi32>
    %c0_i32 = arith.constant 0 : i32
    %12 = vector.broadcast %c0_i32 : i32 to vector<8x16xi32>
    %13 = arith.select %11, %12, %9 : vector<8x16xi1>, vector<8x16xi32>
    %14 = arith.sitofp %13 : vector<8x16xi32> to vector<8x16xf32>
    %15 = arith.index_cast %arg0 : i32 to index
    %16 = memref.load %arg3[%15] : memref<4xi32, #tpu.memory_space<smem>>
    %17 = arith.sitofp %16 : i32 to f32
    %cst = arith.constant 1.000000e+00 : f32
    %18 = arith.divf %cst, %17 : f32
    %19 = vector.broadcast %18 : f32 to vector<8x16xf32>
    %20 = arith.mulf %14, %19 : vector<8x16xf32>
    %21 = math.roundeven %20 : vector<8x16xf32>
    %22 = vector.broadcast %17 : f32 to vector<8x16xf32>
    %23 = arith.mulf %21, %22 : vector<8x16xf32>
    %24 = arith.cmpf oeq, %23, %14 : vector<8x16xf32>
    %cst_0 = arith.constant 0.000000e+00 : f32
    %25 = vector.broadcast %cst_0 : f32 to vector<8x16xf32>
    %26 = arith.select %24, %21, %25 : vector<8x16xi1>, vector<8x16xf32>
    %c0 = arith.constant 0 : index
    %c0_1 = arith.constant 0 : index
    %c0_2 = arith.constant 0 : index
    %27 = vector.load %arg4[%c0, %c0_1, %c0_2] : memref<1x8x16xf32, #tpu.memory_space<vmem>>, vector<1x8x16xf32>
    %28 = vector.shape_cast %27 : vector<1x8x16xf32> to vector<8x16xf32>
    %29 = vector.shape_cast %26 : vector<8x16xf32> to vector<1x8x16xf32>
    tpu.vector_store %arg4[%c0, %c0_1, %c0_2], %29 {strides = array<i32>} : memref<1x8x16xf32, #tpu.memory_space<vmem>>, vector<1x8x16xf32>,
    return
  }
  func.func @transform_0(%arg0: i32, %arg1: i32, %arg2: i32, %arg3: memref<4xi32, #tpu.memory_space<smem>>) -> (i32, i32, i32) {
    %c0_i32 = arith.constant 0 : i32
    return %arg0, %arg1, %arg2 : i32, i32, i32
  }
}

</mosaic_0001>

<bundles_post_ra>
// kernel: tpu_custom_call.1
= control target key start
LH: loop header
LB: loop body
LE: loop exit
PB: predicated region body
PF: predicated region fallthrough
CT: control target
= control target key end

     0   :  { %s411_s0 = inlined_call_operand.hbm [shape: s32[4], index: 0, kind: input, shape index: {}]   ;;  %s412_s1 = inlined_call_operand.hbm [shape: f32[4,8,16], index: 1, kind: output, shape index: {}]  }
   0x1   :  { %s222_s8 = scalar_lea.hbm %s411_s0, 16 }
   0x2   :  { %p223_p0 = scmp.ne.s32.totalorder %s411_s0, %s222_s8  ;;  %p226_p1 = scmp.lt.u32.totalorder %s222_s8, %s411_s0 }
   0x4   :  { %p228_p2 = pnand %p226_p1, %p223_p0 }
   0x6   :  { %231 = shalt.err (!%p228_p2)  }
   0x7   :  { %s298_s13 = smov [#allocation3]  }
   0x8   :  { %7 = dma.hbm_to_smem %s411_s0, 16, %s298_s13, [#allocation2] }
   0x9   :  { %276 = dma.done.wait [#allocation2], 16 }
   0xa   :  { %277 = vsyncadd [#allocation2], 4294967280 }
   0xb   :  { %9 = sfence }
   0xc   :  { %10 = vsyncpa [#allocation5], 0 }
   0xd   :  { %12 = vsyncpa [#allocation5 + $0x1], 0  ;;  %s322_s16 = smov 0   ;;  %s324_s17 = smov 0  }
   0xe   :  { %s326_s18 = smov 0   ;;  %s328_s19 = smov 0  }
   0xf LB: > { %s33_s0 = sadd.s32 1, %s292_s18  ;;  %s166_s20 = sadd.s32 4294967295, %s296_s19   ;;  %s296_s19 = sphi %s328_s19, %s18_s19   ;;  %s292_s18 = sphi %s326_s18, %s417_s18   ;;  %s288_s17 = sphi %s324_s17, %s416_s17   ;;  %s284_s16 = sphi %s322_s16, %s415_s16  }
  0x10   : > { %p35_p3 = scmp.ge.s32.totalorder %s33_s0, 4  ;;  %p53_p4 = scmp.ne.s32.totalorder %s288_s17, %s284_s16 }
  0x11   : > { %s44_s21 = sadd.s32 1, %s288_s17  ;;  %p54_p5 = scmp.eq.s32.totalorder %s166_s20, 3 }
  0x12   : > { %s419_s0 = smov (%p35_p3, %s33_s0), 0  ;;  %p48_p6 = scmp.eq.s32.totalorder %s296_s19, 3 }
  0x13   : > { %s37_s22 = ssub.s32 %s292_s18, %s419_s0  ;;  %p352_p9 = por %p54_p5, %p53_p4 }
  0x14   : > { %p42_p7 = scmp.eq.s32.totalorder %s37_s22, 0  ;;  %p167_p8 = scmp.ne.s32.totalorder %s37_s22, 0 }
  0x15   : > { %p168_p11 = scmp.ge.s32.totalorder %s296_s19, 4 }
  0x16   : > { %s357_s24 = scalar_select %p42_p7, %s288_s17, %s44_s21  }
  0x17   : > { %p359_p10 = por %p167_p8, %p48_p6  ;;  %63 = sbr.rel (%p168_p11) target bundleno = 117 (0x75), region = 12  ;;  %v73_v2 = vlaneseq (!%p168_p11)  ;;  %vm100_vm1 = vcmask (!%p168_p11), 130048  }
  0x18   : > { %s88_s26 = sld [smem:[#allocation3 + %s292_s18]] (!%p168_p11)  ;;  %s68_s28 = sand.u32 (!%p168_p11), 1, %s288_s17  }
  0x19   : > { %v74_v3 = vshrl.u32 (!%p168_p11), %v73_v2, 7  ;;  %v78_v4 = vand.u32 (!%p168_p11), 127, %v73_v2  ;;  %s169_s29 = sshll.u32 (!%p168_p11), %s68_s28, 3  ;;  %s174_s2 = sshll.u32 (!%p168_p11), %s292_s18, 7 }
  0x1a   : > { %s70_s3 = scalar_lea.vmem (!%p168_p11), [#allocation4], %s169_s29  ;;  %s370_s7 = scalar_lea.hbm (!%p168_p11), %s412_s1, %s174_s2 }
  0x1b   : > { %v81_v5 = vsub.s32 (!%p168_p11), %v74_v3, %v78_v4  ;;  %s118_s4 = sshll.u32 (!%p168_p11), %s70_s3, 4  ;;  %s103_s8 = scalar_lea.sflag (!%p168_p11), [#allocation5], %s68_s28  ;;  %s372_s4 = int_to_ptr.vmem [resolvable:$true] %s118_s4 }
  0x1c   : > { %s232_s9 = scalar_lea.vmem (!%p168_p11), %s372_s4, 128  ;;  %s299_s10 = smov (!%p168_p11), [#allocation4]  }
  0x1d   : > { %v83_v6 = vsub.s32 (!%p168_p11), 0, %v81_v5  ;;  %p233_p12 = scmp.ne.s32.totalorder (!%p168_p11), %s372_s4, %s232_s9  ;;  %s236_s11 = sshll.u32 (!%p168_p11), %s299_s10, 4  ;;  %s237_s11 = int_to_ptr.vmem [resolvable:$false] %s236_s11 }
  0x1e   : > { %s89_s27 = scvt.s32.f32 %s88_s26  ;;  %s238_s12 = scalar_lea.vmem %s237_s11, 256 }
  0x1f   : > { %v170_v7 = vmin.u32 %v83_v6, %v81_v5  ;;  %p234_p13 = pnand %p233_p12, %p359_p10  ;;  %p239_p1 = scmp.lt.s32.totalorder %s372_s4, %s237_s11 }
  0x20   : > { %v90_v0 = vstv %s89_s27  ;;  %p240_p2 = scmp.lt.s32.totalorder %s238_s12, %s232_s9 }
  0x21   : > { %220 = vrcp.f32 %v90_v0  ;;  %v171_v8 = vcvt.s32.f32 %v170_v7  ;;  %vm85_vm0 = vcmp.gt.s32.totalorder %v170_v7, 200  ;;  %p235_p0 = pneg %p234_p13 }
  0x22   : > { %p241_p3 = por %p240_p2, %p239_p1 }
  0x23   : > { %v172_v9 = vsel %vm85_vm0, 0.0, %v171_v8 }
  0x24   : > { %p242_p4 = pnand %p241_p3, %p235_p0 }
  0x2b   : > { %v221_v1 = vpop.eup %220 }
  0x2c   : > { %177 = vpush %v221_v1 }
  0x5d   : > { %s178_s30 = spop %177 }
  0x5e   : > { %v93_v10 = vstv %s178_s30 }
  0x5f   : > { %v94_v11 = vmul.f32 %v172_v9, %v93_v10 }
  0x61   : > { %v179_v12 = vround.rtne.f32 %v94_v11 }
  0x63   : > { %v97_v13 = vmul.f32 %v179_v12, %v90_v0 }
  0x65   : > { %vm98_vm2 = vcmp.eq.f32.partialorder %v97_v13, %v172_v9 }
  0x66   : > { %v99_v14 = vsel %vm98_vm2, %v179_v12, 0.0 }
  0x67   : > { %101 = vst.msk [vmem:[%s70_s3] sm:$0xff] %vm100_vm1, %v99_v14 }
  0x68   : > { %245 = shalt.err (!%p242_p4)
}
  0x69   : > { %s246_s13 = scalar_lea.hbm %s370_s7, 128  ;;  %s250_s18 = scalar_lea.hbm %s412_s1, 512 }
  0x6a   : > { %p247_p5 = scmp.ne.s32.totalorder %s370_s7, %s246_s13  ;;  %p251_p8 = scmp.lt.u32.totalorder %s370_s7, %s412_s1 }
  0x6b   : > { %p252_p11 = scmp.lt.u32.totalorder %s250_s18, %s246_s13  ;;  %p254_p13 = scmp.lt.u32.totalorder %s246_s13, %s370_s7 }
  0x6c   : > { %p248_p6 = pnand %p247_p5, %p359_p10 }
  0x6d   : > { %p253_p12 = por %p252_p11, %p251_p8 }
  0x6e   : > { %p249_p7 = pneg %p248_p6 }
  0x6f   : > { %p255_p0 = por %p254_p13, %p253_p12 }
  0x71   : > { %p256_p1 = pnand %p255_p0, %p249_p7 }
  0x73   : > { %259 = shalt.err (!%p256_p1)
}
  0x74   : > { %180 = dma.vmem_to_hbm [thread:$0]  (%p359_p10), %s372_s4, 128, %s370_s7, %s103_s8  }
  0x75 PF: > { %p186_p2 = scmp.ge.s32.totalorder %s296_s19, 1  ;;  %s130_s22 = sand.u32 1, %s284_s16  }
  0x76   : > { %s131_s26 = scalar_lea.sflag [#allocation5], %s130_s22 }
  0x77   : > { %p183_p3 = pnand %p186_p2, %p352_p9 }
  0x79   : > { %279 = dma.done.wait (!%p183_p3), %s131_s26, 128  }
  0x7a   : > { %281 = vsyncadd (!%p183_p3), %s131_s26, 4294967168  ;;  %s18_s19 = sadd.s32 1, %s296_s19   ;;  %s415_s16 = smov %s288_s17 }
  0x7b   : > { %p15_p4 = scmp.ge.s32.totalorder %s18_s19, 5   ;;  %s416_s17 = smov %s357_s24 }
  0x7c   : > { %s417_s18 = smov %s419_s0 }
  0x7d   :  { %17 = sbr.rel (!%p15_p4) target bundleno = 15 (0xf), region = 44 }
  0x84   :  { %136 = vsyncpa [#allocation5], 1 }
  0x85   :  { %138 = vsyncpa [#allocation5 + $0x1], 1 }

</bundles_post_ra>
